<compile_context>
chip_gen: v7x
topology: tpu7x:2x2x1
jax: 0.10.0
libtpu: 0.0.40
codegen_flags: <defaults>
</compile_context>

<pallas_src>
import jax
import jax.numpy as jnp
from jax.experimental import pallas as pl
from jax.experimental.pallas import tpu as pltpu


IN_DIM = 32
HIDDEN_DIM = 200
OUT_DIM = 1
BATCH = 8

H_PAD = 256       # lane-aligned hidden dim (200 -> 256)
OUT_PAD = 128     # lane-dense output tile (sliced back to 1 in the wrapper)
BATCH_TILE = 512  # batch (M) tile for the parallel grid axis (large batches)

BN_EPS = 1e-5
LEAKY_SLOPE = 0.01  # PyTorch nn.LeakyReLU default negative_slope


def _round_up(x, m):
    return (x + m - 1) // m * m


def _regressor_kernel(x_ref, w1_ref, b1_ref, wh_ref, bh_ref, wo_ref, bo_ref,
                      o_ref):
    """One batch-tile of the full (BN-folded) MLP forward.

    x_ref:  (TM, IN_DIM)  f32
    w1_ref: (IN_DIM, H_PAD) bf16     b1_ref: (1, H_PAD) f32
    wh_ref: (4, H_PAD, H_PAD) bf16   bh_ref: (4, 1, H_PAD) f32
    wo_ref: (H_PAD, OUT_PAD) bf16    bo_ref: (1, OUT_PAD) f32
    o_ref:  (TM, OUT_PAD) f32
    """
    def lrelu(h):
        # slope < 1  =>  max(h, slope*h) == LeakyReLU(h); 2 VALU ops.
        return jnp.maximum(h, LEAKY_SLOPE * h)

    # Block 0: (Linear+BN folded) + LeakyReLU.  Dropout is identity in eval.
    # Elementwise math stays f32; operands cast to bf16 only right before the
    # MXU dot, accumulation stays f32.
    h = jnp.dot(x_ref[...].astype(jnp.bfloat16), w1_ref[...],
                preferred_element_type=jnp.float32) + b1_ref[...]
    h = lrelu(h)

    # Blocks 1..4: (Linear+BN folded) + LeakyReLU.
    for i in range(4):
        h = jnp.dot(h.astype(jnp.bfloat16), wh_ref[i],
                    preferred_element_type=jnp.float32) + bh_ref[i]
        h = lrelu(h)

    # Final Linear(hidden, out).
    o_ref[...] = jnp.dot(h.astype(jnp.bfloat16), wo_ref[...],
                         preferred_element_type=jnp.float32) + bo_ref[...]


def fold_bn_and_pad(params):
    """Fold eval-mode BatchNorm into the Linear weights, zero-pad to
    lane-aligned shapes, and cast the weight matrices to bf16.  Done once on
    the host, outside the kernel.  Biases stay f32 (added post-accumulation)."""
    (w1, b1, wh, bh, wo, bo, gamma, beta, mean, var) = params

    def fold(w, b, i):
        scale = gamma[i] * jax.lax.rsqrt(var[i] + BN_EPS)       # (H,)
        return w * scale[None, :], (b - mean[i]) * scale + beta[i]

    w1f, b1f = fold(w1, b1, 0)
    whf, bhf = [], []
    for i in range(4):
        wf, bf = fold(wh[i], bh[i], i + 1)
        whf.append(wf)
        bhf.append(bf)
    whf = jnp.stack(whf)        # (4, H, H)
    bhf = jnp.stack(bhf)        # (4, H)

    # Zero-pad hidden/output lanes: padded output lanes stay exactly 0 through
    # bias + LeakyReLU, and padded input rows of the next weight are 0, so the
    # padding is inert.  No input-feature padding (K=32 kept as-is).
    w1p = jnp.zeros((IN_DIM, H_PAD), jnp.float32).at[:, :HIDDEN_DIM].set(w1f)
    b1p = jnp.zeros((1, H_PAD), jnp.float32).at[0, :HIDDEN_DIM].set(b1f)
    whp = jnp.zeros((4, H_PAD, H_PAD), jnp.float32).at[:, :HIDDEN_DIM, :HIDDEN_DIM].set(whf)
    bhp = jnp.zeros((4, 1, H_PAD), jnp.float32).at[:, 0, :HIDDEN_DIM].set(bhf)
    wop = jnp.zeros((H_PAD, OUT_PAD), jnp.float32).at[:HIDDEN_DIM, :OUT_DIM].set(wo)
    bop = jnp.zeros((1, OUT_PAD), jnp.float32).at[0, :OUT_DIM].set(bo)
    return (w1p.astype(jnp.bfloat16), b1p,
            whp.astype(jnp.bfloat16), bhp,
            wop.astype(jnp.bfloat16), bop)


def _pick_tile(batch):
    """Batch-tile selection: single 16-aligned tile for small batches, split
    into 2 steps for medium batches (fills both v7x TensorCores), 512-row
    tiles for large batches."""
    if batch <= 128:
        return _round_up(max(batch, 16), 16)
    if batch <= 2 * BATCH_TILE:
        return _round_up((batch + 1) // 2, 16)
    return BATCH_TILE


def regressor_forward(x, fused_params):
    """Eval-mode forward. Accepts any batch size; only the batch dim is
    (optionally) zero-padded on the host, then tiled along a 'parallel' grid
    axis."""
    w1, b1, wh, bh, wo, bo = fused_params
    batch = x.shape[0]

    tm = _pick_tile(batch)
    b_pad = _round_up(batch, tm)

    x = x.astype(jnp.float32)
    if b_pad != batch:
        # Single pad op on the batch dim only (padded rows never mix into
        # valid rows — the MLP has no cross-row interaction).
        x = jnp.pad(x, ((0, b_pad - batch), (0, 0)))

    grid = (b_pad // tm,)
    out = pl.pallas_call(
        _regressor_kernel,
        grid=grid,
        in_specs=[
            pl.BlockSpec((tm, IN_DIM), lambda i: (i, 0)),        # x tile
            pl.BlockSpec((IN_DIM, H_PAD), lambda i: (0, 0)),     # w1 (resident)
            pl.BlockSpec((1, H_PAD), lambda i: (0, 0)),          # b1
            pl.BlockSpec((4, H_PAD, H_PAD), lambda i: (0, 0, 0)),  # wh
            pl.BlockSpec((4, 1, H_PAD), lambda i: (0, 0, 0)),    # bh
            pl.BlockSpec((H_PAD, OUT_PAD), lambda i: (0, 0)),    # wo
            pl.BlockSpec((1, OUT_PAD), lambda i: (0, 0)),        # bo
        ],
        out_specs=pl.BlockSpec((tm, OUT_PAD), lambda i: (i, 0)),
        out_shape=jax.ShapeDtypeStruct((b_pad, OUT_PAD), jnp.float32),
        compiler_params=pltpu.CompilerParams(
            dimension_semantics=("parallel",)),
    )(x, w1, b1, wh, bh, wo, bo)
    return out[:batch, :OUT_DIM]


# ------------------------- host-side references ---------------------------

def _xavier_uniform(key, shape):
    fan_in, fan_out = shape[0], shape[1]
    limit = (6.0 / (fan_in + fan_out)) ** 0.5
    return jax.random.uniform(key, shape, jnp.float32, -limit, limit)


def init_params(key):
    """Original (unfolded, unpadded) parameters, PyTorch layout.
    Non-trivial BN stats/affine so the host-side folding is actually tested."""
    ks = jax.random.split(key, 13)
    w1 = _xavier_uniform(ks[0], (IN_DIM, HIDDEN_DIM))
    wh = jnp.stack([_xavier_uniform(ks[1 + i], (HIDDEN_DIM, HIDDEN_DIM))
                    for i in range(4)])                          # (4, H, H)
    wo = _xavier_uniform(ks[5], (HIDDEN_DIM, OUT_DIM))
    b1 = 0.05 * jax.random.normal(ks[6], (HIDDEN_DIM,), jnp.float32)
    bh = 0.05 * jax.random.normal(ks[7], (4, HIDDEN_DIM), jnp.float32)
    bo = 0.05 * jax.random.normal(ks[8], (OUT_DIM,), jnp.float32)
    gamma = jax.random.uniform(ks[9], (5, HIDDEN_DIM), jnp.float32, 0.5, 1.5)
    beta = 0.1 * jax.random.normal(ks[10], (5, HIDDEN_DIM), jnp.float32)
    mean = 0.1 * jax.random.normal(ks[11], (5, HIDDEN_DIM), jnp.float32)
    var = jax.random.uniform(ks[12], (5, HIDDEN_DIM), jnp.float32, 0.5, 1.5)
    return (w1, b1, wh, bh, wo, bo, gamma, beta, mean, var)


def reference_forward_f32(x, params):
    """Pure-JAX eval-mode reference in f32 (unfolded, unpadded)."""
    (w1, b1, wh, bh, wo, bo, gamma, beta, mean, var) = params

    def bn_lrelu(h, i):
        h = (h - mean[i]) / jnp.sqrt(var[i] + BN_EPS) * gamma[i] + beta[i]
        return jnp.where(h >= 0.0, h, LEAKY_SLOPE * h)

    h = bn_lrelu(x @ w1 + b1, 0)
    for i in range(4):
        h = bn_lrelu(h @ wh[i] + bh[i], i + 1)
    return h @ wo + bo


def reference_forward_mixed(x, fused_params):
    """Pure-JAX reference using the exact same mixed-precision math as the
    kernel (BN folded, bf16 operands, f32 accumulation)."""
    w1, b1, wh, bh, wo, bo = fused_params
    x = x.astype(jnp.float32)
    h = jnp.dot(x.astype(jnp.bfloat16), w1,
                preferred_element_type=jnp.float32) + b1
    h = jnp.maximum(h, LEAKY_SLOPE * h)
    for i in range(4):
        h = jnp.dot(h.astype(jnp.bfloat16), wh[i],
                    preferred_element_type=jnp.float32) + bh[i]
        h = jnp.maximum(h, LEAKY_SLOPE * h)
    out = jnp.dot(h.astype(jnp.bfloat16), wo,
                  preferred_element_type=jnp.float32) + bo
    return out[:, :OUT_DIM]


if __name__ == "__main__":
    key = jax.random.PRNGKey(0)
    kx, kx2, kp = jax.random.split(key, 3)
    params = init_params(kp)
    fused = fold_bn_and_pad(params)

    # Small demo batch (single 16-row tile).
    x = jax.random.normal(kx, (BATCH, IN_DIM), jnp.float32)
    out = jax.block_until_ready(regressor_forward(x, fused))
    assert out.shape == (BATCH, OUT_DIM), out.shape
    # Tight check vs. identical mixed-precision math (proves kernel fidelity).
    ref_mixed = reference_forward_mixed(x, fused)
    assert jnp.allclose(out, ref_mixed, atol=2e-3, rtol=2e-3), (out, ref_mixed)
    # Loose check vs. full-f32 reference (bf16-operand error budget).
    ref_f32 = reference_forward_f32(x, params)
    assert jnp.allclose(out, ref_f32, atol=5e-2, rtol=5e-2), (out, ref_f32)

    # Ragged larger batch: exercises batch padding + the 2-step parallel grid.
    x2 = jax.random.normal(kx2, (200, IN_DIM), jnp.float32)
    out2 = jax.block_until_ready(regressor_forward(x2, fused))
    assert out2.shape == (200, OUT_DIM), out2.shape
    ref2_mixed = reference_forward_mixed(x2, fused)
    assert jnp.allclose(out2, ref2_mixed, atol=2e-3, rtol=2e-3)
    ref2_f32 = reference_forward_f32(x2, params)
    assert jnp.allclose(out2, ref2_f32, atol=5e-2, rtol=5e-2)

    print("KERNEL_OK")
</pallas_src>

<mosaic_0001>
module attributes {stable_mosaic.version = 11 : i64} {
  func.func @_regressor_kernel(%arg0: i32, %arg1: memref<16x32xf32, #tpu.memory_space<vmem>>, %arg2: memref<32x256xbf16, #tpu.memory_space<vmem>>, %arg3: memref<1x256xf32, #tpu.memory_space<vmem>>, %arg4: memref<4x256x256xbf16, #tpu.memory_space<vmem>>, %arg5: memref<4x1x256xf32, #tpu.memory_space<vmem>>, %arg6: memref<256x128xbf16, #tpu.memory_space<vmem>>, %arg7: memref<1x128xf32, #tpu.memory_space<vmem>>, %arg8: memref<16x128xf32, #tpu.memory_space<vmem>>) attributes {dimension_semantics = [#tpu.dimension_semantics<parallel>], iteration_bounds = array<i64: 1>, scalar_prefetch = 0 : i64, scratch_operands = 0 : i64, tpu.core_type = #tpu.core_type<tc>, window_params = [{transform_indices = @transform_0, window_bounds = array<i64: 16, 32>}, {pipeline_mode = #tpu.pipeline_mode<synchronous>, transform_indices = @transform_1, window_bounds = array<i64: 32, 256>}, {pipeline_mode = #tpu.pipeline_mode<synchronous>, transform_indices = @transform_2, window_bounds = array<i64: 1, 256>}, {pipeline_mode = #tpu.pipeline_mode<synchronous>, transform_indices = @transform_3, window_bounds = array<i64: 4, 256, 256>}, {pipeline_mode = #tpu.pipeline_mode<synchronous>, transform_indices = @transform_4, window_bounds = array<i64: 4, 1, 256>}, {pipeline_mode = #tpu.pipeline_mode<synchronous>, transform_indices = @transform_5, window_bounds = array<i64: 256, 128>}, {pipeline_mode = #tpu.pipeline_mode<synchronous>, transform_indices = @transform_6, window_bounds = array<i64: 1, 128>}, {transform_indices = @transform_7, window_bounds = array<i64: 16, 128>}]} {
    %c0 = arith.constant 0 : index
    %c0_0 = arith.constant 0 : index
    %0 = vector.load %arg1[%c0, %c0_0] : memref<16x32xf32, #tpu.memory_space<vmem>>, vector<16x32xf32>
    %1 = arith.truncf %0 : vector<16x32xf32> to vector<16x32xbf16>
    %c0_1 = arith.constant 0 : index
    %c0_2 = arith.constant 0 : index
    %2 = vector.load %arg2[%c0_1, %c0_2] : memref<32x256xbf16, #tpu.memory_space<vmem>>, vector<32x256xbf16>
    %cst = arith.constant dense<0.000000e+00> : vector<16x256xf32>
    %3 = tpu.matmul %1, %2, %cst {dimension_numbers = #tpu.dot_dimension_numbers<[1], [0], [0], [1], [0, 0, 1, 1], [], []>} : vector<16x32xbf16>, vector<32x256xbf16>, vector<16x256xf32> -> vector<16x256xf32>
    %c0_3 = arith.constant 0 : index
    %c0_4 = arith.constant 0 : index
    %4 = vector.load %arg3[%c0_3, %c0_4] : memref<1x256xf32, #tpu.memory_space<vmem>>, vector<1x256xf32>
    %5 = vector.broadcast %4 : vector<1x256xf32> to vector<16x256xf32>
    %6 = arith.addf %3, %5 : vector<16x256xf32>
    %cst_5 = arith.constant 0.00999999977 : f32
    %7 = vector.broadcast %cst_5 : f32 to vector<16x256xf32>
    %8 = arith.mulf %7, %6 : vector<16x256xf32>
    %9 = arith.maximumf %6, %8 : vector<16x256xf32>
    %10 = arith.truncf %9 : vector<16x256xf32> to vector<16x256xbf16>
    %c0_6 = arith.constant 0 : index
    %c0_7 = arith.constant 0 : index
    %c0_8 = arith.constant 0 : index
    %11 = vector.load %arg4[%c0_6, %c0_7, %c0_8] : memref<4x256x256xbf16, #tpu.memory_space<vmem>>, vector<1x256x256xbf16>
    %12 = vector.shape_cast %11 : vector<1x256x256xbf16> to vector<256x256xbf16>
    %cst_9 = arith.constant dense<0.000000e+00> : vector<16x256xf32>
    %13 = tpu.matmul %10, %12, %cst_9 {dimension_numbers = #tpu.dot_dimension_numbers<[1], [0], [0], [1], [0, 0, 1, 1], [], []>} : vector<16x256xbf16>, vector<256x256xbf16>, vector<16x256xf32> -> vector<16x256xf32>
    %c0_10 = arith.constant 0 : index
    %c0_11 = arith.constant 0 : index
    %c0_12 = arith.constant 0 : index
    %14 = vector.load %arg5[%c0_10, %c0_11, %c0_12] : memref<4x1x256xf32, #tpu.memory_space<vmem>>, vector<1x1x256xf32>
    %15 = vector.shape_cast %14 : vector<1x1x256xf32> to vector<1x256xf32>
    %16 = vector.broadcast %15 : vector<1x256xf32> to vector<16x256xf32>
    %17 = arith.addf %13, %16 : vector<16x256xf32>
    %cst_13 = arith.constant 0.00999999977 : f32
    %18 = vector.broadcast %cst_13 : f32 to vector<16x256xf32>
    %19 = arith.mulf %18, %17 : vector<16x256xf32>
    %20 = arith.maximumf %17, %19 : vector<16x256xf32>
    %21 = arith.truncf %20 : vector<16x256xf32> to vector<16x256xbf16>
    %c1 = arith.constant 1 : index
    %c0_14 = arith.constant 0 : index
    %c0_15 = arith.constant 0 : index
    %22 = vector.load %arg4[%c1, %c0_14, %c0_15] : memref<4x256x256xbf16, #tpu.memory_space<vmem>>, vector<1x256x256xbf16>
    %23 = vector.shape_cast %22 : vector<1x256x256xbf16> to vector<256x256xbf16>
    %cst_16 = arith.constant dense<0.000000e+00> : vector<16x256xf32>
    %24 = tpu.matmul %21, %23, %cst_16 {dimension_numbers = #tpu.dot_dimension_numbers<[1], [0], [0], [1], [0, 0, 1, 1], [], []>} : vector<16x256xbf16>, vector<256x256xbf16>, vector<16x256xf32> -> vector<16x256xf32>
    %c1_17 = arith.constant 1 : index
    %c0_18 = arith.constant 0 : index
    %c0_19 = arith.constant 0 : index
    %25 = vector.load %arg5[%c1_17, %c0_18, %c0_19] : memref<4x1x256xf32, #tpu.memory_space<vmem>>, vector<1x1x256xf32>
    %26 = vector.shape_cast %25 : vector<1x1x256xf32> to vector<1x256xf32>
    %27 = vector.broadcast %26 : vector<1x256xf32> to vector<16x256xf32>
    %28 = arith.addf %24, %27 : vector<16x256xf32>
    %cst_20 = arith.constant 0.00999999977 : f32
    %29 = vector.broadcast %cst_20 : f32 to vector<16x256xf32>
    %30 = arith.mulf %29, %28 : vector<16x256xf32>
    %31 = arith.maximumf %28, %30 : vector<16x256xf32>
    %32 = arith.truncf %31 : vector<16x256xf32> to vector<16x256xbf16>
    %c2 = arith.constant 2 : index
    %c0_21 = arith.constant 0 : index
    %c0_22 = arith.constant 0 : index
    %33 = vector.load %arg4[%c2, %c0_21, %c0_22] : memref<4x256x256xbf16, #tpu.memory_space<vmem>>, vector<1x256x256xbf16>
    %34 = vector.shape_cast %33 : vector<1x256x256xbf16> to vector<256x256xbf16>
    %cst_23 = arith.constant dense<0.000000e+00> : vector<16x256xf32>
    %35 = tpu.matmul %32, %34, %cst_23 {dimension_numbers = #tpu.dot_dimension_numbers<[1], [0], [0], [1], [0, 0, 1, 1], [], []>} : vector<16x256xbf16>, vector<256x256xbf16>, vector<16x256xf32> -> vector<16x256xf32>
    %c2_24 = arith.constant 2 : index
    %c0_25 = arith.constant 0 : index
    %c0_26 = arith.constant 0 : index
    %36 = vector.load %arg5[%c2_24, %c0_25, %c0_26] : memref<4x1x256xf32, #tpu.memory_space<vmem>>, vector<1x1x256xf32>
    %37 = vector.shape_cast %36 : vector<1x1x256xf32> to vector<1x256xf32>
    %38 = vector.broadcast %37 : vector<1x256xf32> to vector<16x256xf32>
    %39 = arith.addf %35, %38 : vector<16x256xf32>
    %cst_27 = arith.constant 0.00999999977 : f32
    %40 = vector.broadcast %cst_27 : f32 to vector<16x256xf32>
    %41 = arith.mulf %40, %39 : vector<16x256xf32>
    %42 = arith.maximumf %39, %41 : vector<16x256xf32>
    %43 = arith.truncf %42 : vector<16x256xf32> to vector<16x256xbf16>
    %c3 = arith.constant 3 : index
    %c0_28 = arith.constant 0 : index
    %c0_29 = arith.constant 0 : index
    %44 = vector.load %arg4[%c3, %c0_28, %c0_29] : memref<4x256x256xbf16, #tpu.memory_space<vmem>>, vector<1x256x256xbf16>
    %45 = vector.shape_cast %44 : vector<1x256x256xbf16> to vector<256x256xbf16>
    %cst_30 = arith.constant dense<0.000000e+00> : vector<16x256xf32>
    %46 = tpu.matmul %43, %45, %cst_30 {dimension_numbers = #tpu.dot_dimension_numbers<[1], [0], [0], [1], [0, 0, 1, 1], [], []>} : vector<16x256xbf16>, vector<256x256xbf16>, vector<16x256xf32> -> vector<16x256xf32>
    %c3_31 = arith.constant 3 : index
    %c0_32 = arith.constant 0 : index
    %c0_33 = arith.constant 0 : index
    %47 = vector.load %arg5[%c3_31, %c0_32, %c0_33] : memref<4x1x256xf32, #tpu.memory_space<vmem>>, vector<1x1x256xf32>
    %48 = vector.shape_cast %47 : vector<1x1x256xf32> to vector<1x256xf32>
    %49 = vector.broadcast %48 : vector<1x256xf32> to vector<16x256xf32>
    %50 = arith.addf %46, %49 : vector<16x256xf32>
    %cst_34 = arith.constant 0.00999999977 : f32
    %51 = vector.broadcast %cst_34 : f32 to vector<16x256xf32>
    %52 = arith.mulf %51, %50 : vector<16x256xf32>
    %53 = arith.maximumf %50, %52 : vector<16x256xf32>
    %54 = arith.truncf %53 : vector<16x256xf32> to vector<16x256xbf16>
    %c0_35 = arith.constant 0 : index
    %c0_36 = arith.constant 0 : index
    %55 = vector.load %arg6[%c0_35, %c0_36] : memref<256x128xbf16, #tpu.memory_space<vmem>>, vector<256x128xbf16>
    %cst_37 = arith.constant dense<0.000000e+00> : vector<16x128xf32>
    %56 = tpu.matmul %54, %55, %cst_37 {dimension_numbers = #tpu.dot_dimension_numbers<[1], [0], [0], [1], [0, 0, 1, 1], [], []>} : vector<16x256xbf16>, vector<256x128xbf16>, vector<16x128xf32> -> vector<16x128xf32>
    %c0_38 = arith.constant 0 : index
    %c0_39 = arith.constant 0 : index
    %57 = vector.load %arg7[%c0_38, %c0_39] : memref<1x128xf32, #tpu.memory_space<vmem>>, vector<1x128xf32>
    %58 = vector.broadcast %57 : vector<1x128xf32> to vector<16x128xf32>
    %59 = arith.addf %56, %58 : vector<16x128xf32>
    %c0_40 = arith.constant 0 : index
    %c0_41 = arith.constant 0 : index
    %60 = vector.load %arg8[%c0_40, %c0_41] : memref<16x128xf32, #tpu.memory_space<vmem>>, vector<16x128xf32>
    tpu.vector_store %arg8[%c0_40, %c0_41], %59 {strides = array<i32>} : memref<16x128xf32, #tpu.memory_space<vmem>>, vector<16x128xf32>,
    return
  }
  func.func @transform_0(%arg0: i32) -> (i32, i32) {
    %c0_i32 = arith.constant 0 : i32
    %c0_i32_0 = arith.constant 0 : i32
    return %arg0, %c0_i32 : i32, i32
  }
  func.func @transform_1(%arg0: i32) -> (i32, i32) {
    %c0_i32 = arith.constant 0 : i32
    %c0_i32_0 = arith.constant 0 : i32
    %c0_i32_1 = arith.constant 0 : i32
    return %c0_i32, %c0_i32_0 : i32, i32
  }
  func.func @transform_2(%arg0: i32) -> (i32, i32) {
    %c0_i32 = arith.constant 0 : i32
    %c0_i32_0 = arith.constant 0 : i32
    %c0_i32_1 = arith.constant 0 : i32
    return %c0_i32, %c0_i32_0 : i32, i32
  }
  func.func @transform_3(%arg0: i32) -> (i32, i32, i32) {
    %c0_i32 = arith.constant 0 : i32
    %c0_i32_0 = arith.constant 0 : i32
    %c0_i32_1 = arith.constant 0 : i32
    %c0_i32_2 = arith.constant 0 : i32
    return %c0_i32, %c0_i32_0, %c0_i32_1 : i32, i32, i32
  }
  func.func @transform_4(%arg0: i32) -> (i32, i32, i32) {
    %c0_i32 = arith.constant 0 : i32
    %c0_i32_0 = arith.constant 0 : i32
    %c0_i32_1 = arith.constant 0 : i32
    %c0_i32_2 = arith.constant 0 : i32
    return %c0_i32, %c0_i32_0, %c0_i32_1 : i32, i32, i32
  }
  func.func @transform_5(%arg0: i32) -> (i32, i32) {
    %c0_i32 = arith.constant 0 : i32
    %c0_i32_0 = arith.constant 0 : i32
    %c0_i32_1 = arith.constant 0 : i32
    return %c0_i32, %c0_i32_0 : i32, i32
  }
  func.func @transform_6(%arg0: i32) -> (i32, i32) {
    %c0_i32 = arith.constant 0 : i32
    %c0_i32_0 = arith.constant 0 : i32
    %c0_i32_1 = arith.constant 0 : i32
    return %c0_i32, %c0_i32_0 : i32, i32
  }
  func.func @transform_7(%arg0: i32) -> (i32, i32) {
    %c0_i32 = arith.constant 0 : i32
    %c0_i32_0 = arith.constant 0 : i32
    return %arg0, %c0_i32 : i32, i32
  }
}

</mosaic_0001>

<bundles_post_ra>
// kernel: tpu_custom_call.1
= control target key start
LH: loop header
LB: loop body
LE: loop exit
PB: predicated region body
PF: predicated region fallthrough
CT: control target
= control target key end

     0   :  { %12 = vsyncpa [#allocation3], 0  ;;  %s2095_s0 = inlined_call_operand.hbm [shape: f32[16,32], index: 0, kind: input, shape index: {}]   ;;  %s2096_s1 = inlined_call_operand.hbm [shape: bf16[32,256], index: 1, kind: input, shape index: {}]   ;;  %s2097_s2 = inlined_call_operand.vmem [shape: f32[1,256], index: 2, kind: input, shape index: {}]   ;;  %s2098_s3 = inlined_call_operand.hbm [shape: bf16[4,256,256], index: 3, kind: input, shape index: {}]   ;;  %s2099_s4 = inlined_call_operand.vmem [shape: f32[4,1,256], index: 4, kind: input, shape index: {}]   ;;  %s2100_s5 = inlined_call_operand.hbm [shape: bf16[256,128], index: 5, kind: input, shape index: {}]   ;;  %s2101_s6 = inlined_call_operand.vmem [shape: f32[1,128], index: 6, kind: input, shape index: {}]   ;;  %s2102_s7 = inlined_call_operand.hbm [shape: f32[16,128], index: 7, kind: output, shape index: {}]  }
   0x1   :  { %13 = vsyncpa [#allocation6], 0 }
   0x2   :  { %14 = vsyncpa [#allocation9], 0 }
   0x3   :  { %15 = vsyncpa [#allocation4], 0  ;;  %s1927_s24 = smov [#allocation5]   ;;  %s1928_s26 = smov [#allocation2]  }
   0x4   :  { %s33_s25 = sshll.u32 %s1927_s24, 4  ;;  %s21_s27 = sshll.u32 %s1928_s26, 4  ;;  %s34_s25 = int_to_ptr.vmem [resolvable:$true] %s33_s25  ;;  %s1977_s27 = int_to_ptr.vmem [resolvable:$true] %s21_s27 }
   0x5   :  { %s1809_s30 = scalar_lea.hbm %s2096_s1, 512 }
   0x6   :  { %p1810_p0 = scmp.ne.s32.totalorder %s2096_s1, %s1809_s30  ;;  %p1813_p1 = scmp.lt.u32.totalorder %s1809_s30, %s2096_s1 }
   0x8   :  { %p1815_p2 = pnand %p1813_p1, %p1810_p0 }
   0xa   :  { %1818 = shalt.err (!%p1815_p2)
}
   0xb   :  { %s1819_s12 = scalar_lea.vmem %s34_s25, 512  ;;  %p1824_p4 = scmp.lt.s32.totalorder %s34_s25, %s34_s25 }
   0xc   :  { %p1820_p3 = scmp.ne.s32.totalorder %s34_s25, %s1819_s12  ;;  %p1825_p5 = scmp.lt.s32.totalorder %s1819_s12, %s1819_s12 }
   0xe   :  { %p1826_p6 = por %p1825_p5, %p1824_p4 }
  0x10   :  { %p1827_p7 = pnand %p1826_p6, %p1820_p3 }
  0x12   :  { %1830 = shalt.err (!%p1827_p7)
}
  0x13   :  { %s1929_s13 = smov 128   ;;  %s1930_s14 = smov 8  }
  0x14   :  { %39 = dma.hbm_to_vmem [thread:$0]  %s2096_s1, 512, %s34_s25, [#allocation6], %s1929_s13, %s1929_s13, %s1930_s14  }
  0x15   :  { %s1831_s19 = scalar_lea.hbm %s2095_s0, 256 }
  0x16   :  { %p1832_p8 = scmp.ne.s32.totalorder %s2095_s0, %s1831_s19  ;;  %p1835_p9 = scmp.lt.u32.totalorder %s1831_s19, %s2095_s0 }
  0x18   :  { %p1837_p10 = pnand %p1835_p9, %p1832_p8 }
  0x1a   :  { %1840 = shalt.err (!%p1837_p10)
}
  0x1b   :  { %s1841_s24 = scalar_lea.vmem %s1977_s27, 256  ;;  %p1846_p12 = scmp.lt.s32.totalorder %s1977_s27, %s1977_s27 }
  0x1c   :  { %p1842_p11 = scmp.ne.s32.totalorder %s1977_s27, %s1841_s24  ;;  %p1847_p13 = scmp.lt.s32.totalorder %s1841_s24, %s1841_s24 }
  0x1e   :  { %p1848_p0 = por %p1847_p13, %p1846_p12 }
  0x20   :  { %p1849_p1 = pnand %p1848_p0, %p1842_p11 }
  0x22   :  { %1852 = shalt.err (!%p1849_p1)
}
  0x23   :  { %27 = dma.hbm_to_vmem [thread:$0]  %s2095_s0, 256, %s1977_s27, [#allocation3], %s1929_s13, %s1929_s13, %s1930_s14  }
  0x24   :  { %s1931_s26 = smov [#allocation7]   ;;  %s1932_s29 = smov [#allocation8]  }
  0x25   :  { %s47_s28 = sshll.u32 %s1931_s26, 4  ;;  %s61_s30 = sshll.u32 %s1932_s29, 4  ;;  %s48_s28 = int_to_ptr.vmem [resolvable:$true] %s47_s28  ;;  %s2014_s30 = int_to_ptr.vmem [resolvable:$true] %s61_s30 }
  0x26   :  { %s1853_s10 = scalar_lea.hbm %s2098_s3, 16384 }
  0x27   :  { %p1854_p2 = scmp.ne.s32.totalorder %s2098_s3, %s1853_s10  ;;  %p1857_p3 = scmp.lt.u32.totalorder %s1853_s10, %s2098_s3 }
  0x29   :  { %p1859_p4 = pnand %p1857_p3, %p1854_p2 }
  0x2b   :  { %1862 = shalt.err (!%p1859_p4)
}
  0x2c   :  { %s1863_s0 = scalar_lea.vmem %s48_s28, 16384  ;;  %p1868_p6 = scmp.lt.s32.totalorder %s48_s28, %s48_s28 }
  0x2d   :  { %p1864_p5 = scmp.ne.s32.totalorder %s48_s28, %s1863_s0  ;;  %p1869_p7 = scmp.lt.s32.totalorder %s1863_s0, %s1863_s0 }
  0x2f   :  { %p1870_p8 = por %p1869_p7, %p1868_p6 }
  0x31   :  { %p1871_p9 = pnand %p1870_p8, %p1864_p5 }
  0x33   :  { %1874 = shalt.err (!%p1871_p9)
}
  0x34   :  { %53 = dma.hbm_to_vmem [thread:$0]  %s2098_s3, 16384, %s48_s28, [#allocation6], %s1929_s13, %s1929_s13, %s1930_s14  }
  0x35   :  { %s1875_s20 = scalar_lea.hbm %s2100_s5, 2048 }
  0x36   :  { %p1876_p10 = scmp.ne.s32.totalorder %s2100_s5, %s1875_s20  ;;  %p1879_p11 = scmp.lt.u32.totalorder %s1875_s20, %s2100_s5 }
  0x38   :  { %p1881_p12 = pnand %p1879_p11, %p1876_p10 }
  0x3a   :  { %1884 = shalt.err (!%p1881_p12)
}
  0x3b   :  { %s1885_s1 = scalar_lea.vmem %s2014_s30, 2048  ;;  %p1890_p0 = scmp.lt.s32.totalorder %s2014_s30, %s2014_s30 }
  0x3c   :  { %p1886_p13 = scmp.ne.s32.totalorder %s2014_s30, %s1885_s1  ;;  %p1891_p1 = scmp.lt.s32.totalorder %s1885_s1, %s1885_s1 }
  0x3e   :  { %p1892_p2 = por %p1891_p1, %p1890_p0 }
  0x40   :  { %p1893_p3 = pnand %p1892_p2, %p1886_p13 }
  0x42   :  { %1896 = shalt.err (!%p1893_p3)
}
  0x43   :  { %s1933_s3 = smov 64   ;;  %s1934_s25 = smov 4  }
  0x44   :  { %67 = dma.hbm_to_vmem [thread:$0]  %s2100_s5, 2048, %s2014_s30, [#allocation9], %s1933_s3, %s1933_s3, %s1934_s25  }
  0x45   :  { %1919 = dma.done.wait [#allocation3], 256  }
  0x46   :  { %1920 = vsyncadd [#allocation3], 4294967040 }
  0x47   :  { %1921 = dma.done.wait [#allocation6], 16896  }
  0x48   :  { %1922 = vsyncadd [#allocation6], 4294950400 }
  0x49   :  { %1923 = dma.done.wait [#allocation9], 2048  }
  0x4a   :  { %1924 = vsyncadd [#allocation9], 4294965248  ;;  %v1935_v0 = vmov 0   ;;  %v1595_v1 = vld [vmem:[#allocation5 + $0x4] ss:$8 sps:$4 sm:$0xff]   ;;  %v83_v5 = vld [vmem:[#allocation2] sm:$0xff] }
  0x4b   :  { %158 = vmatprep.mubr.bf16.mxu0 %v1935_v0  ;;  %v1597_v2 = vld [vmem:[#allocation5] ss:$8 sps:$4 sm:$0xff]   ;;  %126 = vmatprep.subr.bf16.mxu0 %v1595_v1  ;;  %v1598_v3 = vld [vmem:[#allocation5 + $0x14] ss:$8 sps:$4 sm:$0xff]   ;;  %v1600_v4 = vld [vmem:[#allocation5 + $0x10] ss:$8 sps:$4 sm:$0xff]  }
  0x4c   :  { %127 = vmatpush1.bf16.msra.mxu0 %v1597_v2  ;;  %v84_v6 = vld [vmem:[#allocation2 + $0x8] sm:$0xff]  ;;  %v1601_v7 = vld [vmem:[#allocation7 + $0x4] ss:$8 sps:$4 sm:$0xff]   ;;  %v1603_v8 = vld [vmem:[#allocation7] ss:$8 sps:$4 sm:$0xff]   ;;  %vm122_vm0 = vcmask 261120   ;;  %v92_v2 = vlaneseq }
  0x4d   :  { %128 = vmatprep.subr.bf16.mxu0 %v1598_v3  ;;  %v1604_v9 = vld [vmem:[#allocation7 + $0x14] ss:$8 sps:$4 sm:$0xff]   ;;  %v85_v10 = vpack.c.bf16 %v84_v6, %v83_v5  ;;  %383 = vmatprep.subr.bf16.mxu1 %v1601_v7  ;;  %v1606_v11 = vld [vmem:[#allocation7 + $0x10] ss:$8 sps:$4 sm:$0xff]   ;;  %v1607_v12 = vld [vmem:[#allocation7 + $0x24] ss:$8 sps:$4 sm:$0xff]  }
  0x4e   :  { %384 = vmatpush1.bf16.msra.mxu1 %v1603_v8  ;;  %v1609_v13 = vld [vmem:[#allocation7 + $0x20] ss:$8 sps:$4 sm:$0xff]   ;;  %v1610_v14 = vld [vmem:[#allocation7 + $0x34] ss:$8 sps:$4 sm:$0xff]   ;;  %v1612_v15 = vld [vmem:[#allocation7 + $0x30] ss:$8 sps:$4 sm:$0xff]  }
  0x4f   :  { %385 = vmatprep.subr.bf16.mxu1 %v1604_v9  ;;  %v1613_v16 = vld [vmem:[#allocation7 + $0x44] ss:$8 sps:$4 sm:$0xff]   ;;  %v1615_v17 = vld [vmem:[#allocation7 + $0x40] ss:$8 sps:$4 sm:$0xff]   ;;  %v1616_v18 = vld [vmem:[#allocation7 + $0x54] ss:$8 sps:$4 sm:$0xff]  }
  0x50   :  { %129 = vmatpush1.bf16.msra.mxu0 %v1600_v4  ;;  %v1618_v19 = vld [vmem:[#allocation7 + $0x50] ss:$8 sps:$4 sm:$0xff]   ;;  %v1619_v20 = vld [vmem:[#allocation7 + $0x64] ss:$8 sps:$4 sm:$0xff]   ;;  %v1621_v21 = vld [vmem:[#allocation7 + $0x60] ss:$8 sps:$4 sm:$0xff]  }
  0x51   :  { %v1622_v22 = vld [vmem:[#allocation7 + $0x74] ss:$8 sps:$4 sm:$0xff]   ;;  %v1624_v23 = vld [vmem:[#allocation7 + $0x70] ss:$8 sps:$4 sm:$0xff]   ;;  %v1625_v24 = vld [vmem:[#allocation7 + $0x84] ss:$8 sps:$4 sm:$0xff]  }
  0x52   :  { %386 = vmatpush1.bf16.msra.mxu1 %v1606_v11  ;;  %v1627_v25 = vld [vmem:[#allocation7 + $0x80] ss:$8 sps:$4 sm:$0xff]   ;;  %v1628_v26 = vld [vmem:[#allocation7 + $0x94] ss:$8 sps:$4 sm:$0xff]   ;;  %v1630_v27 = vld [vmem:[#allocation7 + $0x90] ss:$8 sps:$4 sm:$0xff]  }
  0x53   :  { %1414 = vmatmul.mubr.msk.bf16.vlgmr.msra.gmra.mrb[0].mxu0 %vm122_vm0, %v85_v10  ;;  %387 = vmatprep.subr.bf16.mxu1 %v1607_v12  ;;  %v1631_v28 = vld [vmem:[#allocation7 + $0xa4] ss:$8 sps:$4 sm:$0xff]   ;;  %v1633_v29 = vld [vmem:[#allocation7 + $0xa0] ss:$8 sps:$4 sm:$0xff]   ;;  %v1634_v30 = vld [vmem:[#allocation7 + $0xb4] ss:$8 sps:$4 sm:$0xff]  }
  0x54   :  { %v1636_v31 = vld [vmem:[#allocation7 + $0xb0] ss:$8 sps:$4 sm:$0xff]   ;;  %v1637_v32 = vld [vmem:[#allocation7 + $0xc4] ss:$8 sps:$4 sm:$0xff]   ;;  %v1639_v33 = vld [vmem:[#allocation7 + $0xc0] ss:$8 sps:$4 sm:$0xff]  }
  0x55   :  { %v1640_v34 = vld [vmem:[#allocation7 + $0xd4] ss:$8 sps:$4 sm:$0xff]   ;;  %v1642_v35 = vld [vmem:[#allocation7 + $0xd0] ss:$8 sps:$4 sm:$0xff]   ;;  %v1643_v36 = vld [vmem:[#allocation7 + $0xe4] ss:$8 sps:$4 sm:$0xff]  }
  0x56   :  { %388 = vmatpush1.bf16.msra.mxu1 %v1609_v13  ;;  %v1645_v37 = vld [vmem:[#allocation7 + $0xe0] ss:$8 sps:$4 sm:$0xff]   ;;  %v1646_v38 = vld [vmem:[#allocation7 + $0xf4] ss:$8 sps:$4 sm:$0xff]   ;;  %v1648_v39 = vld [vmem:[#allocation7 + $0xf0] ss:$8 sps:$4 sm:$0xff]  }
  0x57   :  { %389 = vmatprep.subr.bf16.mxu1 %v1610_v14  ;;  %v1649_v40 = vld [vmem:[#allocation7 + $0x100] ss:$8 sps:$4 sm:$0xff]   ;;  %v1651_v41 = vld [vmem:[#allocation7 + $0x104] ss:$8 sps:$4 sm:$0xff]   ;;  %v1654_v42 = vld [vmem:[#allocation7 + $0x114] ss:$8 sps:$4 sm:$0xff]  }
  0x58   :  { %642 = vmatprep.subr.bf16.mxu0 %v1651_v41  ;;  %v1652_v43 = vld [vmem:[#allocation7 + $0x110] ss:$8 sps:$4 sm:$0xff]   ;;  %v1657_v44 = vld [vmem:[#allocation7 + $0x124] ss:$8 sps:$4 sm:$0xff]   ;;  %v1655_v45 = vld [vmem:[#allocation7 + $0x120] ss:$8 sps:$4 sm:$0xff]  }
  0x59   :  { %643 = vmatpush1.bf16.msra.mxu0 %v1649_v40  ;;  %v1660_v46 = vld [vmem:[#allocation7 + $0x134] ss:$8 sps:$4 sm:$0xff]   ;;  %v1658_v47 = vld [vmem:[#allocation7 + $0x130] ss:$8 sps:$4 sm:$0xff]   ;;  %v1663_v48 = vld [vmem:[#allocation7 + $0x144] ss:$8 sps:$4 sm:$0xff]  }
  0x5a   :  { %390 = vmatpush1.bf16.msra.mxu1 %v1612_v15  ;;  %644 = vmatprep.subr.bf16.mxu0 %v1654_v42  ;;  %v1661_v49 = vld [vmem:[#allocation7 + $0x140] ss:$8 sps:$4 sm:$0xff]   ;;  %v1666_v50 = vld [vmem:[#allocation7 + $0x154] ss:$8 sps:$4 sm:$0xff]   ;;  %v1664_v51 = vld [vmem:[#allocation7 + $0x150] ss:$8 sps:$4 sm:$0xff]  }
  0x5b   :  { %391 = vmatprep.subr.bf16.mxu1 %v1613_v16  ;;  %v1669_v52 = vld [vmem:[#allocation7 + $0x164] ss:$8 sps:$4 sm:$0xff]   ;;  %v1667_v53 = vld [vmem:[#allocation7 + $0x160] ss:$8 sps:$4 sm:$0xff]   ;;  %v1672_v54 = vld [vmem:[#allocation7 + $0x174] ss:$8 sps:$4 sm:$0xff]  }
  0x5c   :  { %v1670_v55 = vld [vmem:[#allocation7 + $0x170] ss:$8 sps:$4 sm:$0xff]   ;;  %v1675_v56 = vld [vmem:[#allocation7 + $0x184] ss:$8 sps:$4 sm:$0xff]   ;;  %v1673_v57 = vld [vmem:[#allocation7 + $0x180] ss:$8 sps:$4 sm:$0xff]  }
  0x5d   :  { %645 = vmatpush1.bf16.msra.mxu0 %v1652_v43  ;;  %v1678_v58 = vld [vmem:[#allocation7 + $0x194] ss:$8 sps:$4 sm:$0xff]   ;;  %v1676_v59 = vld [vmem:[#allocation7 + $0x190] ss:$8 sps:$4 sm:$0xff]   ;;  %v1681_v60 = vld [vmem:[#allocation7 + $0x1a4] ss:$8 sps:$4 sm:$0xff]  }
  0x5e   :  { %392 = vmatpush1.bf16.msra.mxu1 %v1615_v17  ;;  %646 = vmatprep.subr.bf16.mxu0 %v1657_v44  ;;  %v1679_v61 = vld [vmem:[#allocation7 + $0x1a0] ss:$8 sps:$4 sm:$0xff]   ;;  %v1684_v62 = vld [vmem:[#allocation7 + $0x1b4] ss:$8 sps:$4 sm:$0xff]   ;;  %v1682_v63 = vld [vmem:[#allocation7 + $0x1b0] ss:$8 sps:$4 sm:$0xff]  }
  0x5f   :  { %393 = vmatprep.subr.bf16.mxu1 %v1616_v18  ;;  %v1687_v0 = vld [vmem:[#allocation7 + $0x1c4] ss:$8 sps:$4 sm:$0xff]   ;;  %v1685_v1 = vld [vmem:[#allocation7 + $0x1c0] ss:$8 sps:$4 sm:$0xff]   ;;  %v93_v3 = vshrl.u32 %v92_v2, 7  ;;  %s1936_s0 = smov [#allocation10]  }
  0x60   :  { %v90_v5 = vld [vmem:[%s2097_s2] sm:$0x3]  ;;  %v1711_v41 = vld [vmem:[#allocation7 + $0x244] ss:$8 sps:$4 sm:$0xff]   ;;  %v1709_v42 = vld [vmem:[#allocation7 + $0x240] ss:$8 sps:$4 sm:$0xff]  }
  0x61   :  { %647 = vmatpush1.bf16.msra.mxu0 %v1655_v45  ;;  %v2048_v4 = vsub.s32 0, %v93_v3  ;;  %v2053_v6 = vsub.s32 1, %v93_v3  ;;  %v1706_v40 = vld [vmem:[#allocation7 + $0x230] ss:$8 sps:$4 sm:$0xff]   ;;  %v1714_v43 = vld [vmem:[#allocation7 + $0x254] ss:$8 sps:$4 sm:$0xff]  }
  0x62   :  { %394 = vmatpush1.bf16.msra.mxu1 %v1618_v19  ;;  %648 = vmatprep.subr.bf16.mxu0 %v1660_v46  ;;  %v1712_v44 = vld [vmem:[#allocation7 + $0x250] ss:$8 sps:$4 sm:$0xff]   ;;  %v1717_v45 = vld [vmem:[#allocation7 + $0x264] ss:$8 sps:$4 sm:$0xff]   ;;  %v1715_v46 = vld [vmem:[#allocation7 + $0x260] ss:$8 sps:$4 sm:$0xff]  }
  0x63   :  { %395 = vmatprep.subr.bf16.mxu1 %v1619_v20  ;;  %v95_v7 = vrot.slane %v90_v5, %v2048_v4  ;;  %v99_v8 = vrot.slane %v90_v5, %v2053_v6  ;;  %s1396_s27 = sshll.u32 %s1936_s0, 4  ;;  %s1397_s27 = int_to_ptr.vmem [resolvable:$true] %s1396_s27 }
  0x64   :  { %s1897_s17 = scalar_lea.vmem %s1397_s27, 256  ;;  %p1902_p5 = scmp.lt.s32.totalorder %s1397_s27, %s1397_s27 }
  0x65   :  { %649 = vmatpush1.bf16.msra.mxu0 %v1658_v47  ;;  %v1720_v47 = vld [vmem:[#allocation7 + $0x274] ss:$8 sps:$4 sm:$0xff]   ;;  %p1898_p4 = scmp.ne.s32.totalorder %s1397_s27, %s1897_s17  ;;  %p1903_p6 = scmp.lt.s32.totalorder %s1897_s17, %s1897_s17 }
  0x66   :  { %396 = vmatpush1.bf16.msra.mxu1 %v1621_v21  ;;  %650 = vmatprep.subr.bf16.mxu0 %v1663_v48  ;;  %v1718_v48 = vld [vmem:[#allocation7 + $0x270] ss:$8 sps:$4 sm:$0xff]  }
  0x67   :  { %397 = vmatprep.subr.bf16.mxu1 %v1622_v22  ;;  %p1904_p7 = por %p1903_p6, %p1902_p5 }
  0x69   :  { %651 = vmatpush1.bf16.msra.mxu0 %v1661_v49  ;;  %v1723_v49 = vld [vmem:[#allocation7 + $0x284] ss:$8 sps:$4 sm:$0xff]   ;;  %p1905_p8 = pnand %p1904_p7, %p1898_p4 }
  0x6a   :  { %398 = vmatpush1.bf16.msra.mxu1 %v1624_v23  ;;  %652 = vmatprep.subr.bf16.mxu0 %v1666_v50  ;;  %v1721_v50 = vld [vmem:[#allocation7 + $0x280] ss:$8 sps:$4 sm:$0xff]  }
  0x6b   :  { %399 = vmatprep.subr.bf16.mxu1 %v1625_v24 }
  0x6d   :  { %653 = vmatpush1.bf16.msra.mxu0 %v1664_v51  ;;  %v1726_v51 = vld [vmem:[#allocation7 + $0x294] ss:$8 sps:$4 sm:$0xff]  }
  0x6e   :  { %400 = vmatpush1.bf16.msra.mxu1 %v1627_v25  ;;  %654 = vmatprep.subr.bf16.mxu0 %v1669_v52  ;;  %v1724_v52 = vld [vmem:[#allocation7 + $0x290] ss:$8 sps:$4 sm:$0xff]  }
  0x6f   :  { %401 = vmatprep.subr.bf16.mxu1 %v1628_v26 }
  0x71   :  { %655 = vmatpush1.bf16.msra.mxu0 %v1667_v53  ;;  %v1729_v53 = vld [vmem:[#allocation7 + $0x2a4] ss:$8 sps:$4 sm:$0xff]  }
  0x72   :  { %402 = vmatpush1.bf16.msra.mxu1 %v1630_v27  ;;  %656 = vmatprep.subr.bf16.mxu0 %v1672_v54  ;;  %v1690_v27 = vld [vmem:[#allocation7 + $0x1d4] ss:$8 sps:$4 sm:$0xff]   ;;  %v1727_v54 = vld [vmem:[#allocation7 + $0x2a0] ss:$8 sps:$4 sm:$0xff]  }
  0x73   :  { %403 = vmatprep.subr.bf16.mxu1 %v1631_v28  ;;  %v1688_v28 = vld [vmem:[#allocation7 + $0x1d0] ss:$8 sps:$4 sm:$0xff]  }
  0x75   :  { %657 = vmatpush1.bf16.msra.mxu0 %v1670_v55  ;;  %v1732_v55 = vld [vmem:[#allocation7 + $0x2b4] ss:$8 sps:$4 sm:$0xff]  }
  0x76   :  { %404 = vmatpush1.bf16.msra.mxu1 %v1633_v29  ;;  %658 = vmatprep.subr.bf16.mxu0 %v1675_v56  ;;  %v1693_v29 = vld [vmem:[#allocation7 + $0x1e4] ss:$8 sps:$4 sm:$0xff]   ;;  %v1730_v56 = vld [vmem:[#allocation7 + $0x2b0] ss:$8 sps:$4 sm:$0xff]  }
  0x77   :  { %405 = vmatprep.subr.bf16.mxu1 %v1634_v30  ;;  %v1691_v30 = vld [vmem:[#allocation7 + $0x1e0] ss:$8 sps:$4 sm:$0xff]  }
  0x79   :  { %659 = vmatpush1.bf16.msra.mxu0 %v1673_v57  ;;  %v1735_v57 = vld [vmem:[#allocation7 + $0x2c4] ss:$8 sps:$4 sm:$0xff]  }
  0x7a   :  { %406 = vmatpush1.bf16.msra.mxu1 %v1636_v31  ;;  %660 = vmatprep.subr.bf16.mxu0 %v1678_v58  ;;  %v1696_v31 = vld [vmem:[#allocation7 + $0x1f4] ss:$8 sps:$4 sm:$0xff]   ;;  %v1733_v58 = vld [vmem:[#allocation7 + $0x2c0] ss:$8 sps:$4 sm:$0xff]  }
  0x7b   :  { %407 = vmatprep.subr.bf16.mxu1 %v1637_v32  ;;  %v1694_v32 = vld [vmem:[#allocation7 + $0x1f0] ss:$8 sps:$4 sm:$0xff]  }
  0x7d   :  { %661 = vmatpush1.bf16.msra.mxu0 %v1676_v59  ;;  %v211_v59 = vld [vmem:[%s2099_s4] sm:$0x3] }
  0x7e   :  { %408 = vmatpush1.bf16.msra.mxu1 %v1639_v33  ;;  %662 = vmatprep.subr.bf16.mxu0 %v1681_v60  ;;  %v1697_v33 = vld [vmem:[#allocation7 + $0x200] ss:$8 sps:$4 sm:$0xff]   ;;  %v216_v60 = vrot.slane %v211_v59, %v2048_v4 }
  0x7f   :  { %409 = vmatprep.subr.bf16.mxu1 %v1640_v34  ;;  %v1699_v34 = vld [vmem:[#allocation7 + $0x204] ss:$8 sps:$4 sm:$0xff]  }
  0x81   :  { %663 = vmatpush1.bf16.msra.mxu0 %v1679_v61  ;;  %v220_v61 = vrot.slane %v211_v59, %v2053_v6 }
  0x82   :  { %410 = vmatpush1.bf16.msra.mxu1 %v1642_v35  ;;  %664 = vmatprep.subr.bf16.mxu0 %v1684_v62  ;;  %v1702_v35 = vld [vmem:[#allocation7 + $0x214] ss:$8 sps:$4 sm:$0xff]  }
  0x83   :  { %411 = vmatprep.subr.bf16.mxu1 %v1643_v36  ;;  %v1700_v36 = vld [vmem:[#allocation7 + $0x210] ss:$8 sps:$4 sm:$0xff]  }
  0x85   :  { %665 = vmatpush1.bf16.msra.mxu0 %v1682_v63 }
  0x86   :  { %412 = vmatpush1.bf16.msra.mxu1 %v1645_v37  ;;  %666 = vmatprep.subr.bf16.mxu0 %v1687_v0  ;;  %v1705_v37 = vld [vmem:[#allocation7 + $0x224] ss:$8 sps:$4 sm:$0xff]  }
  0x87   :  { %413 = vmatprep.subr.bf16.mxu1 %v1646_v38  ;;  %v1703_v38 = vld [vmem:[#allocation7 + $0x220] ss:$8 sps:$4 sm:$0xff]  }
  0x89   :  { %667 = vmatpush1.bf16.msra.mxu0 %v1685_v1 }
  0x8a   :  { %414 = vmatpush1.bf16.msra.mxu1 %v1648_v39  ;;  %668 = vmatprep.subr.bf16.mxu0 %v1690_v27  ;;  %v1708_v39 = vld [vmem:[#allocation7 + $0x234] ss:$8 sps:$4 sm:$0xff]   ;;  %v1748_v27 = vld [vmem:[#allocation7 + $0x310] ss:$8 sps:$4 sm:$0xff]  }
  0x8b   :  { %901 = vmatprep.subr.bf16.mxu1 %v1699_v34  ;;  %v1762_v34 = vld [vmem:[#allocation7 + $0x354] ss:$8 sps:$4 sm:$0xff]  }
  0x8d   :  { %669 = vmatpush1.bf16.msra.mxu0 %v1688_v28  ;;  %v1753_v28 = vld [vmem:[#allocation7 + $0x324] ss:$8 sps:$4 sm:$0xff]  }
  0x8e   :  { %670 = vmatprep.subr.bf16.mxu0 %v1693_v29  ;;  %v1751_v29 = vld [vmem:[#allocation7 + $0x320] ss:$8 sps:$4 sm:$0xff]  }
  0x91   :  { %671 = vmatpush1.bf16.msra.mxu0 %v1691_v30  ;;  %v1756_v30 = vld [vmem:[#allocation7 + $0x334] ss:$8 sps:$4 sm:$0xff]  }
  0x92   :  { %672 = vmatprep.subr.bf16.mxu0 %v1696_v31  ;;  %v1754_v31 = vld [vmem:[#allocation7 + $0x330] ss:$8 sps:$4 sm:$0xff]  }
  0x95   :  { %673 = vmatpush1.bf16.msra.mxu0 %v1694_v32  ;;  %v1759_v32 = vld [vmem:[#allocation7 + $0x344] ss:$8 sps:$4 sm:$0xff]  }
 0x126   :  { %v160_v9 = vpop.f32.mrb[0].mxu0 }
 0x127   :  { %v161_v10 = vadd.f32 %v160_v9, %v95_v7  ;;  %v162_v11 = vpop.f32.mrb[1].mxu0 }
 0x128   :  { %v163_v12 = vadd.f32 %v162_v11, %v99_v8  ;;  %v164_v13 = vpop.f32.mrb[2].mxu0 }
 0x129   :  { %v169_v14 = vmul.f32 0.01, %v161_v10  ;;  %v165_v15 = vadd.f32 %v164_v13, %v95_v7  ;;  %v166_v16 = vpop.f32.mrb[3].mxu0 }
 0x12a   :  { %v170_v17 = vmul.f32 0.01, %v163_v12  ;;  %v167_v18 = vadd.f32 %v166_v16, %v99_v8 }
 0x12b   :  { %v171_v19 = vmul.f32 0.01, %v165_v15  ;;  %v173_v21 = vmax.f32 %v161_v10, %v169_v14 }
 0x12c   :  { %v172_v20 = vmul.f32 0.01, %v167_v18  ;;  %v174_v23 = vmax.f32 %v163_v12, %v170_v17 }
 0x12d   :  { %v175_v22 = vmax.f32 %v165_v15, %v171_v19  ;;  %v1736_v19 = vld [vmem:[#allocation7 + $0x2d0] ss:$8 sps:$4 sm:$0xff]  }
 0x12e   :  { %v176_v24 = vmax.f32 %v167_v18, %v172_v20  ;;  %v1738_v18 = vld [vmem:[#allocation7 + $0x2d4] ss:$8 sps:$4 sm:$0xff]   ;;  %v1741_v20 = vld [vmem:[#allocation7 + $0x2e4] ss:$8 sps:$4 sm:$0xff]  }
 0x12f   :  { %v177_v25 = vpack.c.bf16 %v175_v22, %v173_v21  ;;  %v1739_v21 = vld [vmem:[#allocation7 + $0x2e0] ss:$8 sps:$4 sm:$0xff]   ;;  %v1744_v22 = vld [vmem:[#allocation7 + $0x2f4] ss:$8 sps:$4 sm:$0xff]  }
 0x130   :  { %v178_v26 = vpack.c.bf16 %v176_v24, %v174_v23  ;;  %v1742_v23 = vld [vmem:[#allocation7 + $0x2f0] ss:$8 sps:$4 sm:$0xff]   ;;  %v1745_v24 = vld [vmem:[#allocation7 + $0x300] ss:$8 sps:$4 sm:$0xff]  }
 0x132   :  { %415 = vmatprep.mubr.bf16.mxu1 %v178_v26  ;;  %v1750_v26 = vld [vmem:[#allocation7 + $0x314] ss:$8 sps:$4 sm:$0xff]  }
 0x133   :  { %416 = vmatmul.mubr.bf16.vlgmr.msra.gmra.mrb[0].mxu1 %v177_v25  ;;  %v1747_v25 = vld [vmem:[#allocation7 + $0x304] ss:$8 sps:$4 sm:$0xff]  }
 0x134   :  { %902 = vmatpush1.bf16.msra.mxu1 %v1697_v33  ;;  %1160 = vmatprep.subr.bf16.mxu0 %v1747_v25  ;;  %v1757_v33 = vld [vmem:[#allocation7 + $0x340] ss:$8 sps:$4 sm:$0xff]   ;;  %v1480_v25 = vld [vmem:[%s2099_s4 + $0x4] sm:$0x3] }
 0x135   :  { %903 = vmatprep.subr.bf16.mxu1 %v1702_v35  ;;  %v1760_v35 = vld [vmem:[#allocation7 + $0x350] ss:$8 sps:$4 sm:$0xff]  }
 0x138   :  { %904 = vmatpush1.bf16.msra.mxu1 %v1700_v36  ;;  %v1765_v36 = vld [vmem:[#allocation7 + $0x364] ss:$8 sps:$4 sm:$0xff]  }
 0x139   :  { %905 = vmatprep.subr.bf16.mxu1 %v1705_v37  ;;  %v1763_v37 = vld [vmem:[#allocation7 + $0x360] ss:$8 sps:$4 sm:$0xff]  }
 0x13c   :  { %906 = vmatpush1.bf16.msra.mxu1 %v1703_v38  ;;  %v1768_v38 = vld [vmem:[#allocation7 + $0x374] ss:$8 sps:$4 sm:$0xff]  }
 0x13d   :  { %907 = vmatprep.subr.bf16.mxu1 %v1708_v39  ;;  %v1766_v39 = vld [vmem:[#allocation7 + $0x370] ss:$8 sps:$4 sm:$0xff]  }
 0x140   :  { %908 = vmatpush1.bf16.msra.mxu1 %v1706_v40  ;;  %v1771_v40 = vld [vmem:[#allocation7 + $0x384] ss:$8 sps:$4 sm:$0xff]  }
 0x141   :  { %909 = vmatprep.subr.bf16.mxu1 %v1711_v41  ;;  %v1769_v41 = vld [vmem:[#allocation7 + $0x380] ss:$8 sps:$4 sm:$0xff]  }
 0x144   :  { %910 = vmatpush1.bf16.msra.mxu1 %v1709_v42  ;;  %v1774_v42 = vld [vmem:[#allocation7 + $0x394] ss:$8 sps:$4 sm:$0xff]  }
 0x145   :  { %911 = vmatprep.subr.bf16.mxu1 %v1714_v43  ;;  %v1772_v43 = vld [vmem:[#allocation7 + $0x390] ss:$8 sps:$4 sm:$0xff]  }
 0x148   :  { %912 = vmatpush1.bf16.msra.mxu1 %v1712_v44  ;;  %v1777_v44 = vld [vmem:[#allocation7 + $0x3a4] ss:$8 sps:$4 sm:$0xff]  }
 0x149   :  { %913 = vmatprep.subr.bf16.mxu1 %v1717_v45  ;;  %v1775_v45 = vld [vmem:[#allocation7 + $0x3a0] ss:$8 sps:$4 sm:$0xff]  }
 0x14c   :  { %914 = vmatpush1.bf16.msra.mxu1 %v1715_v46  ;;  %v1780_v46 = vld [vmem:[#allocation7 + $0x3b4] ss:$8 sps:$4 sm:$0xff]  }
 0x14d   :  { %915 = vmatprep.subr.bf16.mxu1 %v1720_v47  ;;  %v1778_v47 = vld [vmem:[#allocation7 + $0x3b0] ss:$8 sps:$4 sm:$0xff]  }
 0x150   :  { %916 = vmatpush1.bf16.msra.mxu1 %v1718_v48  ;;  %v1783_v48 = vld [vmem:[#allocation7 + $0x3c4] ss:$8 sps:$4 sm:$0xff]  }
 0x151   :  { %917 = vmatprep.subr.bf16.mxu1 %v1723_v49  ;;  %v1781_v49 = vld [vmem:[#allocation7 + $0x3c0] ss:$8 sps:$4 sm:$0xff]  }
 0x154   :  { %918 = vmatpush1.bf16.msra.mxu1 %v1721_v50  ;;  %v1447_v50 = vld [vmem:[%s2099_s4 + $0x2] sm:$0x3] }
 0x155   :  { %919 = vmatprep.subr.bf16.mxu1 %v1726_v51  ;;  %v475_v51 = vrot.slane %v1447_v50, %v2048_v4 }
 0x158   :  { %920 = vmatpush1.bf16.msra.mxu1 %v1724_v52  ;;  %v479_v52 = vrot.slane %v1447_v50, %v2053_v6  ;;  %v1807_v50 = vld [vmem:[#allocation8 + $0x78] sm:$0xff]  }
 0x159   :  { %921 = vmatprep.subr.bf16.mxu1 %v1729_v53 }
 0x15c   :  { %922 = vmatpush1.bf16.msra.mxu1 %v1727_v54 }
 0x15d   :  { %923 = vmatprep.subr.bf16.mxu1 %v1732_v55 }
 0x160   :  { %924 = vmatpush1.bf16.msra.mxu1 %v1730_v56 }
 0x161   :  { %925 = vmatprep.subr.bf16.mxu1 %v1735_v57 }
 0x164   :  { %926 = vmatpush1.bf16.msra.mxu1 %v1733_v58 }
 0x165   :  { %927 = vmatprep.subr.bf16.mxu1 %v1738_v18  ;;  %v1796_v18 = vld [vmem:[#allocation8 + $0x8] sm:$0xff]  }
 0x168   :  { %928 = vmatpush1.bf16.msra.mxu1 %v1736_v19  ;;  %v1797_v19 = vld [vmem:[#allocation8 + $0x50] sm:$0xff]  }
 0x169   :  { %929 = vmatprep.subr.bf16.mxu1 %v1741_v20  ;;  %v1798_v20 = vld [vmem:[#allocation8 + $0x10] sm:$0xff]  }
 0x16c   :  { %930 = vmatpush1.bf16.msra.mxu1 %v1739_v21  ;;  %v1799_v21 = vld [vmem:[#allocation8 + $0x58] sm:$0xff]  }
 0x16d   :  { %931 = vmatprep.subr.bf16.mxu1 %v1744_v22  ;;  %v1800_v22 = vld [vmem:[#allocation8 + $0x18] sm:$0xff]  }
 0x170   :  { %932 = vmatpush1.bf16.msra.mxu1 %v1742_v23  ;;  %v1801_v23 = vld [vmem:[#allocation8 + $0x60] sm:$0xff]  }
 0x206   :  { %v417_v62 = vpop.f32.mrb[0].mxu1 }
 0x207   :  { %v418_v63 = vadd.f32 %v417_v62, %v216_v60  ;;  %v419_v0 = vpop.f32.mrb[1].mxu1 }
 0x208   :  { %v420_v1 = vadd.f32 %v419_v0, %v220_v61  ;;  %v421_v2 = vpop.f32.mrb[2].mxu1 }
 0x209   :  { %v426_v3 = vmul.f32 0.01, %v418_v63  ;;  %v422_v5 = vadd.f32 %v421_v2, %v216_v60  ;;  %v423_v7 = vpop.f32.mrb[3].mxu1 }
 0x20a   :  { %v427_v8 = vmul.f32 0.01, %v420_v1  ;;  %v424_v9 = vadd.f32 %v423_v7, %v220_v61 }
 0x20b   :  { %v428_v10 = vmul.f32 0.01, %v422_v5  ;;  %v430_v12 = vmax.f32 %v418_v63, %v426_v3 }
 0x20c   :  { %v429_v11 = vmul.f32 0.01, %v424_v9  ;;  %v431_v14 = vmax.f32 %v420_v1, %v427_v8 }
 0x20d   :  { %v432_v13 = vmax.f32 %v422_v5, %v428_v10  ;;  %v1784_v10 = vld [vmem:[#allocation7 + $0x3d0] ss:$8 sps:$4 sm:$0xff]  }
 0x20e   :  { %v433_v15 = vmax.f32 %v424_v9, %v429_v11  ;;  %v1786_v9 = vld [vmem:[#allocation7 + $0x3d4] ss:$8 sps:$4 sm:$0xff]   ;;  %v1789_v11 = vld [vmem:[#allocation7 + $0x3e4] ss:$8 sps:$4 sm:$0xff]  }
 0x20f   :  { %v434_v16 = vpack.c.bf16 %v432_v13, %v430_v12  ;;  %v1787_v12 = vld [vmem:[#allocation7 + $0x3e0] ss:$8 sps:$4 sm:$0xff]   ;;  %v1792_v13 = vld [vmem:[#allocation7 + $0x3f4] ss:$8 sps:$4 sm:$0xff]  }
 0x210   :  { %v435_v17 = vpack.c.bf16 %v433_v15, %v431_v14  ;;  %v1790_v14 = vld [vmem:[#allocation7 + $0x3f0] ss:$8 sps:$4 sm:$0xff]   ;;  %v1793_v15 = vld [vmem:[#allocation8 + $0x40] sm:$0xff]  }
 0x211   :  { %1563 = vmatprep.subr.bf16.mxu1 %v1793_v15 }
 0x212   :  { %674 = vmatprep.mubr.bf16.mxu0 %v435_v17  ;;  %v1795_v17 = vld [vmem:[#allocation8 + $0x48] sm:$0xff]  }
 0x213   :  { %675 = vmatmul.mubr.bf16.vlgmr.msra.gmra.mrb[4].mxu0 %v434_v16  ;;  %v1794_v16 = vld [vmem:[#allocation8] sm:$0xff]  }
 0x214   :  { %1161 = vmatpush1.bf16.msra.mxu0 %v1745_v24  ;;  %v1802_v24 = vld [vmem:[#allocation8 + $0x20] sm:$0xff]  }
 0x215   :  { %1162 = vmatprep.subr.bf16.mxu0 %v1750_v26  ;;  %v734_v26 = vrot.slane %v1480_v25, %v2048_v4 }
 0x218   :  { %1163 = vmatpush1.bf16.msra.mxu0 %v1748_v27  ;;  %v738_v27 = vrot.slane %v1480_v25, %v2053_v6 }
 0x219   :  { %1164 = vmatprep.subr.bf16.mxu0 %v1753_v28 }
 0x21c   :  { %1165 = vmatpush1.bf16.msra.mxu0 %v1751_v29 }
 0x21d   :  { %1166 = vmatprep.subr.bf16.mxu0 %v1756_v30 }
 0x220   :  { %1167 = vmatpush1.bf16.msra.mxu0 %v1754_v31 }
 0x221   :  { %1168 = vmatprep.subr.bf16.mxu0 %v1759_v32 }
 0x224   :  { %1169 = vmatpush1.bf16.msra.mxu0 %v1757_v33 }
 0x225   :  { %1170 = vmatprep.subr.bf16.mxu0 %v1762_v34 }
 0x228   :  { %1171 = vmatpush1.bf16.msra.mxu0 %v1760_v35 }
 0x229   :  { %1172 = vmatprep.subr.bf16.mxu0 %v1765_v36 }
 0x22c   :  { %1173 = vmatpush1.bf16.msra.mxu0 %v1763_v37 }
 0x22d   :  { %1174 = vmatprep.subr.bf16.mxu0 %v1768_v38 }
 0x230   :  { %1175 = vmatpush1.bf16.msra.mxu0 %v1766_v39 }
 0x231   :  { %1176 = vmatprep.subr.bf16.mxu0 %v1771_v40 }
 0x234   :  { %1177 = vmatpush1.bf16.msra.mxu0 %v1769_v41 }
 0x235   :  { %1178 = vmatprep.subr.bf16.mxu0 %v1774_v42 }
 0x238   :  { %1179 = vmatpush1.bf16.msra.mxu0 %v1772_v43 }
 0x239   :  { %1180 = vmatprep.subr.bf16.mxu0 %v1777_v44 }
 0x23c   :  { %1181 = vmatpush1.bf16.msra.mxu0 %v1775_v45 }
 0x23d   :  { %1182 = vmatprep.subr.bf16.mxu0 %v1780_v46  ;;  %v1803_v46 = vld [vmem:[#allocation8 + $0x68] sm:$0xff]  }
 0x240   :  { %1183 = vmatpush1.bf16.msra.mxu0 %v1778_v47  ;;  %v1804_v47 = vld [vmem:[#allocation8 + $0x28] sm:$0xff]  }
 0x241   :  { %1184 = vmatprep.subr.bf16.mxu0 %v1783_v48  ;;  %v1805_v48 = vld [vmem:[#allocation8 + $0x70] sm:$0xff]  }
 0x244   :  { %1185 = vmatpush1.bf16.msra.mxu0 %v1781_v49  ;;  %v1806_v49 = vld [vmem:[#allocation8 + $0x30] sm:$0xff]  }
 0x245   :  { %1186 = vmatprep.subr.bf16.mxu0 %v1786_v9 }
 0x248   :  { %1187 = vmatpush1.bf16.msra.mxu0 %v1784_v10  ;;  %v1546_v10 = vld [vmem:[%s2101_s6] ss:$0 sm:$0xff] }
 0x249   :  { %1188 = vmatprep.subr.bf16.mxu0 %v1789_v11 }
 0x24c   :  { %1189 = vmatpush1.bf16.msra.mxu0 %v1787_v12 }
 0x24d   :  { %1190 = vmatprep.subr.bf16.mxu0 %v1792_v13 }
 0x250   :  { %1191 = vmatpush1.bf16.msra.mxu0 %v1790_v14 }
 0x2e6   :  { %v676_v53 = vpop.f32.mrb[4].mxu0 }
 0x2e7   :  { %v677_v54 = vadd.f32 %v676_v53, %v475_v51  ;;  %v678_v55 = vpop.f32.mrb[5].mxu0 }
 0x2e8   :  { %v679_v56 = vadd.f32 %v678_v55, %v479_v52  ;;  %v680_v57 = vpop.f32.mrb[6].mxu0 }
 0x2e9   :  { %v685_v58 = vmul.f32 0.01, %v677_v54  ;;  %v681_v59 = vadd.f32 %v680_v57, %v475_v51  ;;  %v682_v60 = vpop.f32.mrb[7].mxu0  ;;  %v1808_v51 = vld [vmem:[#allocation8 + $0x38] sm:$0xff]  }
 0x2ea   :  { %v686_v61 = vmul.f32 0.01, %v679_v56  ;;  %v683_v62 = vadd.f32 %v682_v60, %v479_v52  ;;  %v1513_v52 = vld [vmem:[%s2099_s4 + $0x6] sm:$0x3] }
 0x2eb   :  { %v687_v63 = vmul.f32 0.01, %v681_v59  ;;  %v689_v1 = vmax.f32 %v677_v54, %v685_v58  ;;  %v993_v53 = vrot.slane %v1513_v52, %v2048_v4  ;;  %v997_v54 = vrot.slane %v1513_v52, %v2053_v6 }
 0x2ec   :  { %v688_v0 = vmul.f32 0.01, %v683_v62  ;;  %v690_v3 = vmax.f32 %v679_v56, %v686_v61 }
 0x2ed   :  { %v691_v2 = vmax.f32 %v681_v59, %v687_v63 }
 0x2ee   :  { %v692_v5 = vmax.f32 %v683_v62, %v688_v0 }
 0x2ef   :  { %v693_v7 = vpack.c.bf16 %v691_v2, %v689_v1 }
 0x2f0   :  { %v694_v8 = vpack.c.bf16 %v692_v5, %v690_v3 }
 0x2f2   :  { %933 = vmatprep.mubr.bf16.mxu1 %v694_v8 }
 0x2f3   :  { %934 = vmatmul.mubr.bf16.vlgmr.msra.gmra.mrb[4].mxu1 %v693_v7 }
 0x2f4   :  { %1564 = vmatpush3.bf16.msra.mxu1 %v1794_v16 }
 0x2f5   :  { %1565 = vmatprep.subr.bf16.mxu1 %v1795_v17 }
 0x2f8   :  { %1566 = vmatpush3.bf16.msra.mxu1 %v1796_v18 }
 0x2f9   :  { %1567 = vmatprep.subr.bf16.mxu1 %v1797_v19 }
 0x2fc   :  { %1568 = vmatpush3.bf16.msra.mxu1 %v1798_v20 }
 0x2fd   :  { %1569 = vmatprep.subr.bf16.mxu1 %v1799_v21 }
 0x300   :  { %1570 = vmatpush3.bf16.msra.mxu1 %v1800_v22 }
 0x301   :  { %1571 = vmatprep.subr.bf16.mxu1 %v1801_v23 }
 0x304   :  { %1572 = vmatpush3.bf16.msra.mxu1 %v1802_v24 }
 0x305   :  { %1573 = vmatprep.subr.bf16.mxu1 %v1803_v46 }
 0x308   :  { %1574 = vmatpush3.bf16.msra.mxu1 %v1804_v47 }
 0x309   :  { %1575 = vmatprep.subr.bf16.mxu1 %v1805_v48 }
 0x30c   :  { %1576 = vmatpush3.bf16.msra.mxu1 %v1806_v49 }
 0x30d   :  { %1577 = vmatprep.subr.bf16.mxu1 %v1807_v50 }
 0x310   :  { %1578 = vmatpush3.bf16.msra.mxu1 %v1808_v51 }
 0x3c6   :  { %v935_v28 = vpop.f32.mrb[4].mxu1 }
 0x3c7   :  { %v936_v29 = vadd.f32 %v935_v28, %v734_v26  ;;  %v937_v30 = vpop.f32.mrb[5].mxu1 }
 0x3c8   :  { %v938_v31 = vadd.f32 %v937_v30, %v738_v27  ;;  %v939_v32 = vpop.f32.mrb[6].mxu1 }
 0x3c9   :  { %v944_v33 = vmul.f32 0.01, %v936_v29  ;;  %v940_v34 = vadd.f32 %v939_v32, %v734_v26  ;;  %v941_v35 = vpop.f32.mrb[7].mxu1 }
 0x3ca   :  { %v945_v36 = vmul.f32 0.01, %v938_v31  ;;  %v942_v37 = vadd.f32 %v941_v35, %v738_v27 }
 0x3cb   :  { %v946_v38 = vmul.f32 0.01, %v940_v34  ;;  %v948_v40 = vmax.f32 %v936_v29, %v944_v33 }
 0x3cc   :  { %v947_v39 = vmul.f32 0.01, %v942_v37  ;;  %v949_v42 = vmax.f32 %v938_v31, %v945_v36 }
 0x3cd   :  { %v950_v41 = vmax.f32 %v940_v34, %v946_v38 }
 0x3ce   :  { %v951_v43 = vmax.f32 %v942_v37, %v947_v39 }
 0x3cf   :  { %v952_v44 = vpack.c.bf16 %v950_v41, %v948_v40 }
 0x3d0   :  { %v953_v45 = vpack.c.bf16 %v951_v43, %v949_v42 }
 0x3d2   :  { %1192 = vmatprep.mubr.bf16.mxu0 %v953_v45 }
 0x3d3   :  { %1193 = vmatmul.mubr.bf16.vlgmr.msra.gmra.mrb[8].mxu0 %v952_v44 }
 0x4a6   :  { %v1194_v55 = vpop.f32.mrb[8].mxu0 }
 0x4a7   :  { %v1195_v56 = vadd.f32 %v1194_v55, %v993_v53  ;;  %v1196_v57 = vpop.f32.mrb[9].mxu0 }
 0x4a8   :  { %v1197_v58 = vadd.f32 %v1196_v57, %v997_v54  ;;  %v1198_v59 = vpop.f32.mrb[10].mxu0 }
 0x4a9   :  { %v1203_v60 = vmul.f32 0.01, %v1195_v56  ;;  %v1199_v61 = vadd.f32 %v1198_v59, %v993_v53  ;;  %v1200_v62 = vpop.f32.mrb[11].mxu0 }
 0x4aa   :  { %v1204_v63 = vmul.f32 0.01, %v1197_v58  ;;  %v1201_v0 = vadd.f32 %v1200_v62, %v997_v54 }
 0x4ab   :  { %v1205_v1 = vmul.f32 0.01, %v1199_v61  ;;  %v1207_v3 = vmax.f32 %v1195_v56, %v1203_v60 }
 0x4ac   :  { %v1206_v2 = vmul.f32 0.01, %v1201_v0  ;;  %v1208_v7 = vmax.f32 %v1197_v58, %v1204_v63 }
 0x4ad   :  { %v1209_v5 = vmax.f32 %v1199_v61, %v1205_v1 }
 0x4ae   :  { %v1210_v8 = vmax.f32 %v1201_v0, %v1206_v2 }
 0x4af   :  { %v1211_v9 = vpack.c.bf16 %v1209_v5, %v1207_v3 }
 0x4b0   :  { %v1212_v4 = vpack.c.bf16 %v1210_v8, %v1208_v7 }
 0x4b2   :  { %1380 = vmatprep.mubr.bf16.mxu1 %v1212_v4 }
 0x4b3   :  { %1381 = vmatmul.mubr.bf16.vlgmr.msra.gmra.mrb[8].mxu1 %v1211_v9 }
 0x586   :  { %v1579_v6 = vpop.f32.mrb[8].mxu1 }
 0x587   :  { %v1580_v11 = vpop.f32.mrb[9].mxu1 }
 0x588   :  { %v1581_v12 = vadd.f32 %v1580_v11, %v1579_v6  ;;  %v1582_v13 = vpop.f32.mrb[10].mxu1 }
 0x589   :  { %v1583_v14 = vpop.f32.mrb[11].mxu1 }
 0x58a   :  { %v1383_v15 = vadd.f32 %v1581_v12, %v1546_v10  ;;  %v1584_v16 = vadd.f32 %v1583_v14, %v1582_v13 }
 0x58c   :  { %1389 = vst [vmem:[#allocation10] sm:$0xff] %v1383_v15  ;;  %v1386_v17 = vadd.f32 %v1584_v16, %v1546_v10 }
 0x58e   :  { %1390 = vst [vmem:[#allocation10 + $0x8] sm:$0xff] %v1386_v17 }
 0x58f   :  { %1908 = shalt.err (!%p1905_p8)
}
 0x590   :  { %s1909_s19 = scalar_lea.hbm %s2102_s7, 256 }
 0x591   :  { %p1910_p9 = scmp.ne.s32.totalorder %s2102_s7, %s1909_s19  ;;  %p1913_p10 = scmp.lt.u32.totalorder %s1909_s19, %s2102_s7 }
 0x593   :  { %p1915_p11 = pnand %p1913_p10, %p1910_p9 }
 0x595   :  { %1918 = shalt.err (!%p1915_p11)
}
 0x596   :  { %1402 = dma.vmem_to_hbm [thread:$0]  %s1397_s27, 256, %s2102_s7, [#allocation4], %s1929_s13, %s1929_s13, %s1930_s14  }
 0x597   :  { %1925 = dma.done.wait [#allocation4], 256  }
 0x598   :  { %1926 = vsyncadd [#allocation4], 4294967040 }
 0x599   :  { %1406 = vsyncpa [#allocation3], 1 }
 0x59a   :  { %1407 = vsyncpa [#allocation6], 1 }
 0x59b   :  { %1408 = vsyncpa [#allocation9], 1 }
 0x59c   :  { %1409 = vsyncpa [#allocation4], 1 }

</bundles_post_ra>
